<compile_context>
chip_gen: v7x
topology: tpu7x:2x2x1
jax: 0.10.0
libtpu: 0.0.40
codegen_flags: <defaults>
</compile_context>

<pallas_src>
import math

import jax
import jax.numpy as jnp
from jax.experimental import pallas as pl
from jax.experimental.pallas import tpu as pltpu

_MiB = 1024 * 1024


def _tpu_vmem_budget():
    """Returns (physical VMEM bytes, default scoped-VMEM guess, is_v5_or_older)."""
    try:
        phys = int(pltpu.get_tpu_info().vmem_capacity_bytes)
    except Exception:
        phys = 64 * _MiB                 # conservative: v7x has the smallest VMEM
    try:
        kind = jax.devices()[0].device_kind.lower()
    except Exception:
        kind = ""
    newer = any(t in kind for t in ("v6", "v7", "7x"))
    default_scoped = 32 * _MiB if newer else 16 * _MiB   # v5e default is 16 MiB
    return phys, default_scoped, (not newer)


def _nbytes(shape, dtype):
    return math.prod(shape) * jnp.dtype(dtype).itemsize


def _per_step_vmem(tq, S, D, d_k, mxu_dtype, out_dtype, attn_dtype, return_attn):
    """Per-grid-step VMEM: double-buffered pipeline blocks + f32 softmax temps."""
    pipelined = (_nbytes((1, tq, D), mxu_dtype)            # q rows
                 + _nbytes((1, D, d_k), mxu_dtype)         # W_q (per head)
                 + _nbytes((1, 1, d_k, S), mxu_dtype)      # K^T (per head)
                 + _nbytes((1, 1, S, d_k), mxu_dtype)      # V   (per head)
                 + _nbytes((1, 1, tq, d_k), out_dtype))    # ctx block
    if return_attn:
        pipelined += _nbytes((1, 1, tq, S), attn_dtype)    # attn block
    # scores / e / p in f32 plus q/ctx f32 accumulators (Mosaic internal scratch)
    temps = 3 * _nbytes((tq, S), jnp.float32) + 2 * _nbytes((tq, d_k), jnp.float32)
    return 2 * pipelined + temps


def _make_mha_kernel(return_attn, exp_dtype):
    """One (batch, head, q-tile) grid step.

    q_in_ref : [1, tq, D]     query rows for this tile
    wq_ref   : [1, D, d_k]    per-head W_q with 1/sqrt(d_k) folded in
    kT_ref   : [1, 1, d_k, S] pre-projected, pre-transposed K for this head
    v_ref    : [1, 1, S, d_k] pre-projected V for this head
    ctx_ref  : [1, 1, tq, d_k]
    attn_ref : [1, 1, tq, S]  (only when return_attn)
    """
    def kernel(q_in_ref, wq_ref, kT_ref, v_ref, ctx_ref, *rest):
        cdt = q_in_ref.dtype           # MXU input dtype (bf16 by default, or f32)

        # Q projection for this tile; scale pre-folded into W_q.
        q = jnp.dot(q_in_ref[0], wq_ref[0],
                    preferred_element_type=jnp.float32)           # [tq, d_k] f32

        # Plain [tq, d_k] @ [d_k, S] — K stored pre-transposed, so no per-tile
        # relayout and the RHS is lane-dense along S.
        scores = jnp.dot(q.astype(cdt), kT_ref[0, 0],
                         preferred_element_type=jnp.float32)      # [tq, S] f32

        # Numerically stable softmax; max-subtract and row-sum stay in f32,
        # exp optionally runs in bf16 (v6e/v7x, attn map not materialized).
        m = jnp.max(scores, axis=-1, keepdims=True)
        e = jnp.exp((scores - m).astype(exp_dtype))
        denom = jnp.sum(e.astype(jnp.float32), axis=-1, keepdims=True)
        p = e.astype(jnp.float32) * pl.reciprocal(denom, approx=True)

        ctx = jnp.dot(p.astype(cdt), v_ref[0, 0],
                      preferred_element_type=jnp.float32)         # [tq, d_k] f32
        ctx_ref[0, 0] = ctx.astype(ctx_ref.dtype)

        if return_attn:
            attn_ref = rest[0]
            attn_ref[0, 0] = p.astype(attn_ref.dtype)

    return kernel


def multi_head_attention(query, key, value, in_proj_weight, *, h,
                         mxu_dtype=jnp.bfloat16, attn_dtype=jnp.bfloat16,
                         return_attn=True, exp_dtype=None, q_block=None):
    """Pallas forward of MultiHeadAttention (eval mode, mask=None).

    query/key/value : [B, S, d_model]
    in_proj_weight  : [3*d_model, d_model]   (PyTorch F.linear weight layout)
    returns (x [B, S, d_model], attn [B, h, S, S]) or just x when
    return_attn=False.
    """
    B, S, D = query.shape
    assert D % h == 0
    d_k = D // h
    out_dtype = query.dtype

    phys_vmem, default_scoped, is_v5_or_older = _tpu_vmem_budget()
    vmem_cap = max(default_scoped, phys_vmem - 16 * _MiB)   # keep >=16 MiB headroom

    if exp_dtype is None:
        exp_dtype = (jnp.bfloat16
                     if (not return_attn and not is_v5_or_older)
                     else jnp.float32)

    # ---- q-sequence tile: generation- and VMEM-budget-aware ----------------
    def fits(tq):
        need = _per_step_vmem(tq, S, D, d_k, mxu_dtype, out_dtype, attn_dtype,
                              return_attn)
        return need * 5 // 4 <= vmem_cap

    if q_block is None:
        ladder = (256, 128) if is_v5_or_older else (512, 256, 128)
        candidates = [c for c in ladder if c <= S and S % c == 0]
        q_block = S if not candidates else candidates[-1]
        for c in candidates:                       # largest that fits the budget
            if fits(c):
                q_block = c
                break
    assert S % q_block == 0 and (q_block == S or q_block % 8 == 0)
    nq = S // q_block

    # ---- weights & wrapper-side pre-projection of K / V --------------------
    scale = 1.0 / math.sqrt(d_k)

    def split_heads(w):                     # [D_out, D_in] -> [h, D_in, d_k]
        return jnp.transpose(w.T.reshape(D, h, d_k), (1, 0, 2))

    wq = split_heads(in_proj_weight[0 * D:1 * D]) * scale   # scale folded into W_q
    wk = split_heads(in_proj_weight[1 * D:2 * D])
    wv = split_heads(in_proj_weight[2 * D:3 * D])

    # K pre-transposed per head so the in-kernel scores matmul needs no relayout.
    kT_h = jnp.einsum('bsd,hdk->bhks', key, wk,
                      precision='highest').astype(mxu_dtype)     # [B, h, d_k, S]
    v_h = jnp.einsum('bsd,hdk->bhsk', value, wv,
                     precision='highest').astype(mxu_dtype)      # [B, h, S, d_k]
    wq_h = wq.astype(mxu_dtype)
    q_c = query.astype(mxu_dtype)

    # ---- VMEM limit: override only when needed, clamped to the chip --------
    per_step = _per_step_vmem(q_block, S, D, d_k, mxu_dtype, out_dtype,
                              attn_dtype, return_attn)
    vmem_limit = None
    if per_step > default_scoped:
        vmem_limit = int(min(max(per_step * 5 // 4, 32 * _MiB), vmem_cap))

    # ---- specs --------------------------------------------------------------
    q_spec = pl.BlockSpec((1, q_block, D), lambda b, hd, qi: (b, qi, 0))
    wq_spec = pl.BlockSpec((1, D, d_k), lambda b, hd, qi: (hd, 0, 0))
    kT_spec = pl.BlockSpec((1, 1, d_k, S), lambda b, hd, qi: (b, hd, 0, 0))
    v_spec = pl.BlockSpec((1, 1, S, d_k), lambda b, hd, qi: (b, hd, 0, 0))

    out_shapes = [jax.ShapeDtypeStruct((B, h, S, d_k), out_dtype)]
    out_specs = [pl.BlockSpec((1, 1, q_block, d_k),
                              lambda b, hd, qi: (b, hd, qi, 0))]
    if return_attn:
        out_shapes.append(jax.ShapeDtypeStruct((B, h, S, S), attn_dtype))
        out_specs.append(pl.BlockSpec((1, 1, q_block, S),
                                      lambda b, hd, qi: (b, hd, qi, 0)))

    outs = pl.pallas_call(
        _make_mha_kernel(return_attn, exp_dtype),
        out_shape=out_shapes,
        grid_spec=pltpu.PrefetchScalarGridSpec(
            num_scalar_prefetch=0,
            grid=(B, h, nq),
            in_specs=[q_spec, wq_spec, kT_spec, v_spec],
            out_specs=out_specs,
        ),
        compiler_params=pltpu.CompilerParams(
            # No in-kernel K/V cache -> all axes independent; batch/head/q-tile
            # can all shard across v7x's two TensorCores.
            dimension_semantics=("parallel", "parallel", "parallel"),
            vmem_limit_bytes=vmem_limit,
        ),
    )(q_c, wq_h, kT_h, v_h)

    ctx_heads = outs[0]
    # Head merge [B, h, S, d_k] -> [B, S, D]: wrapper-side layout plumbing.
    # TODO(synk): process 128/d_k heads per grid step (or write directly into a
    # [B, S, D] block when d_k % 128 == 0) for a fully lane-dense ctx store.
    x = jnp.transpose(ctx_heads, (0, 2, 1, 3)).reshape(B, S, D)
    if return_attn:
        return x, outs[1]
    return x


def _reference(query, key, value, in_proj_weight, *, h):
    """Pure-JAX f32 reference mirroring the PyTorch forward (eval mode)."""
    B, S, D = query.shape
    d_k = D // h
    hp = 'highest'
    wq = in_proj_weight[0 * D:1 * D]
    wk = in_proj_weight[1 * D:2 * D]
    wv = in_proj_weight[2 * D:3 * D]
    q = jnp.einsum('bsd,ed->bse', query, wq, precision=hp)
    k = jnp.einsum('bsd,ed->bse', key, wk, precision=hp)
    v = jnp.einsum('bsd,ed->bse', value, wv, precision=hp)
    qh = q.reshape(B, S, h, d_k).transpose(0, 2, 1, 3)
    kh = k.reshape(B, S, h, d_k).transpose(0, 2, 1, 3)
    vh = v.reshape(B, S, h, d_k).transpose(0, 2, 1, 3)
    scores = jnp.einsum('bhqd,bhkd->bhqk', qh, kh,
                        precision=hp) / jnp.sqrt(jnp.float32(d_k))
    p = jax.nn.softmax(scores, axis=-1)
    ctx = jnp.einsum('bhqk,bhkd->bhqd', p, vh, precision=hp)
    x = ctx.transpose(0, 2, 1, 3).reshape(B, S, D)
    return x, p


if __name__ == "__main__":
    # Small shapes consistent with the module: batch=2, seq=8, d_model=32, h=4.
    B, S, D, H = 2, 8, 32, 4

    key0 = jax.random.PRNGKey(0)
    k_q, k_k, k_v, k_w = jax.random.split(key0, 4)

    query = jax.random.normal(k_q, (B, S, D), dtype=jnp.float32)
    key_in = jax.random.normal(k_k, (B, S, D), dtype=jnp.float32)
    value = jax.random.normal(k_v, (B, S, D), dtype=jnp.float32)

    # kaiming_normal_ on (3*d_model, d_model): std = sqrt(2 / fan_in), fan_in = d_model.
    in_proj_weight = (jax.random.normal(k_w, (3 * D, D), dtype=jnp.float32)
                      * math.sqrt(2.0 / D))

    ref_out, ref_attn = _reference(query, key_in, value, in_proj_weight, h=H)

    # 1) f32-MXU / f32-attn path: tight check (tolerance covers approx reciprocal).
    out32, attn32 = multi_head_attention(query, key_in, value, in_proj_weight,
                                         h=H, mxu_dtype=jnp.float32,
                                         attn_dtype=jnp.float32)
    jax.block_until_ready((out32, attn32))
    assert out32.shape == (B, S, D) and attn32.shape == (B, H, S, S)
    assert jnp.allclose(out32, ref_out, atol=5e-3, rtol=5e-3)
    assert jnp.allclose(attn32, ref_attn, atol=5e-3, rtol=5e-3)

    # 2) default path: bf16 MXU inputs (f32 accumulation), bf16 attention map.
    out16, attn16 = multi_head_attention(query, key_in, value, in_proj_weight, h=H)
    jax.block_until_ready((out16, attn16))
    assert out16.shape == (B, S, D) and attn16.shape == (B, H, S, S)
    assert jnp.allclose(out16, ref_out, atol=1e-1, rtol=1e-1)
    assert jnp.allclose(attn16.astype(jnp.float32), ref_attn, atol=5e-2, rtol=5e-2)

    # 3) need_weights=False-style path: attention map never materialized.
    out_na = multi_head_attention(query, key_in, value, in_proj_weight, h=H,
                                  return_attn=False)
    out_na = jax.block_until_ready(out_na)
    assert out_na.shape == (B, S, D)
    assert jnp.allclose(out_na, ref_out, atol=1e-1, rtol=1e-1)

    print("KERNEL_OK")
</pallas_src>

<mosaic_0001>
module attributes {stable_mosaic.version = 11 : i64} {
  func.func @kernel(%arg0: i32, %arg1: i32, %arg2: i32, %arg3: memref<1x8x32xf32, #tpu.memory_space<vmem>>, %arg4: memref<1x32x8xf32, #tpu.memory_space<vmem>>, %arg5: memref<1x1x8x8xf32, #tpu.memory_space<vmem>>, %arg6: memref<1x1x8x8xf32, #tpu.memory_space<vmem>>, %arg7: memref<1x1x8x8xf32, #tpu.memory_space<vmem>>, %arg8: memref<1x1x8x8xf32, #tpu.memory_space<vmem>>) attributes {dimension_semantics = [#tpu.dimension_semantics<parallel>, #tpu.dimension_semantics<parallel>, #tpu.dimension_semantics<parallel>], iteration_bounds = array<i64: 2, 4, 1>, scalar_prefetch = 0 : i64, scratch_operands = 0 : i64, tpu.core_type = #tpu.core_type<tc>, window_params = [{transform_indices = @transform_0, window_bounds = array<i64: 1, 8, 32>}, {transform_indices = @transform_1, window_bounds = array<i64: 1, 32, 8>}, {transform_indices = @transform_2, window_bounds = array<i64: 1, 1, 8, 8>}, {transform_indices = @transform_3, window_bounds = array<i64: 1, 1, 8, 8>}, {transform_indices = @transform_4, window_bounds = array<i64: 1, 1, 8, 8>}, {transform_indices = @transform_5, window_bounds = array<i64: 1, 1, 8, 8>}]} {
    %c0 = arith.constant 0 : index
    %c0_0 = arith.constant 0 : index
    %c0_1 = arith.constant 0 : index
    %0 = vector.load %arg3[%c0, %c0_0, %c0_1] : memref<1x8x32xf32, #tpu.memory_space<vmem>>, vector<1x8x32xf32>
    %1 = vector.shape_cast %0 : vector<1x8x32xf32> to vector<8x32xf32>
    %c0_2 = arith.constant 0 : index
    %c0_3 = arith.constant 0 : index
    %c0_4 = arith.constant 0 : index
    %2 = vector.load %arg4[%c0_2, %c0_3, %c0_4] : memref<1x32x8xf32, #tpu.memory_space<vmem>>, vector<1x32x8xf32>
    %3 = vector.shape_cast %2 : vector<1x32x8xf32> to vector<32x8xf32>
    %cst = arith.constant dense<0.000000e+00> : vector<8x8xf32>
    %4 = tpu.matmul %1, %3, %cst {dimension_numbers = #tpu.dot_dimension_numbers<[1], [0], [0], [1], [0, 0, 1, 1], [], []>} : vector<8x32xf32>, vector<32x8xf32>, vector<8x8xf32> -> vector<8x8xf32>
    %c0_5 = arith.constant 0 : index
    %c0_6 = arith.constant 0 : index
    %c0_7 = arith.constant 0 : index
    %c0_8 = arith.constant 0 : index
    %5 = vector.load %arg5[%c0_5, %c0_6, %c0_7, %c0_8] : memref<1x1x8x8xf32, #tpu.memory_space<vmem>>, vector<1x1x8x8xf32>
    %6 = vector.shape_cast %5 : vector<1x1x8x8xf32> to vector<8x8xf32>
    %cst_9 = arith.constant dense<0.000000e+00> : vector<8x8xf32>
    %7 = tpu.matmul %4, %6, %cst_9 {dimension_numbers = #tpu.dot_dimension_numbers<[1], [0], [0], [1], [0, 0, 1, 1], [], []>} : vector<8x8xf32>, vector<8x8xf32>, vector<8x8xf32> -> vector<8x8xf32>
    %cst_10 = arith.constant dense<0xFF800000> : vector<8xf32>
    %8 = vector.multi_reduction <maximumf>, %7, %cst_10 [1] : vector<8x8xf32> to vector<8xf32>
    %9 = vector.shape_cast %8 : vector<8xf32> to vector<8x1xf32>
    %10 = vector.broadcast %9 : vector<8x1xf32> to vector<8x8xf32>
    %11 = arith.subf %7, %10 : vector<8x8xf32>
    %12 = math.exp %11 : vector<8x8xf32>
    %cst_11 = arith.constant dense<0.000000e+00> : vector<8xf32>
    %13 = vector.multi_reduction <add>, %12, %cst_11 [1] : vector<8x8xf32> to vector<8xf32>
    %14 = vector.shape_cast %13 : vector<8xf32> to vector<8x1xf32>
    %15 = tpu.reciprocal %14 {approx = true} : vector<8x1xf32> -> vector<8x1xf32>
    %16 = vector.broadcast %15 : vector<8x1xf32> to vector<8x8xf32>
    %17 = arith.mulf %12, %16 : vector<8x8xf32>
    %c0_12 = arith.constant 0 : index
    %c0_13 = arith.constant 0 : index
    %c0_14 = arith.constant 0 : index
    %c0_15 = arith.constant 0 : index
    %18 = vector.load %arg6[%c0_12, %c0_13, %c0_14, %c0_15] : memref<1x1x8x8xf32, #tpu.memory_space<vmem>>, vector<1x1x8x8xf32>
    %19 = vector.shape_cast %18 : vector<1x1x8x8xf32> to vector<8x8xf32>
    %cst_16 = arith.constant dense<0.000000e+00> : vector<8x8xf32>
    %20 = tpu.matmul %17, %19, %cst_16 {dimension_numbers = #tpu.dot_dimension_numbers<[1], [0], [0], [1], [0, 0, 1, 1], [], []>} : vector<8x8xf32>, vector<8x8xf32>, vector<8x8xf32> -> vector<8x8xf32>
    %c0_17 = arith.constant 0 : index
    %c0_18 = arith.constant 0 : index
    %c0_19 = arith.constant 0 : index
    %c0_20 = arith.constant 0 : index
    %21 = vector.load %arg7[%c0_17, %c0_18, %c0_19, %c0_20] : memref<1x1x8x8xf32, #tpu.memory_space<vmem>>, vector<1x1x8x8xf32>
    %22 = vector.shape_cast %21 : vector<1x1x8x8xf32> to vector<8x8xf32>
    %23 = vector.shape_cast %20 : vector<8x8xf32> to vector<1x1x8x8xf32>
    tpu.vector_store %arg7[%c0_17, %c0_18, %c0_19, %c0_20], %23 {strides = array<i32>} : memref<1x1x8x8xf32, #tpu.memory_space<vmem>>, vector<1x1x8x8xf32>,
    %c0_21 = arith.constant 0 : index
    %c0_22 = arith.constant 0 : index
    %c0_23 = arith.constant 0 : index
    %c0_24 = arith.constant 0 : index
    %24 = vector.load %arg8[%c0_21, %c0_22, %c0_23, %c0_24] : memref<1x1x8x8xf32, #tpu.memory_space<vmem>>, vector<1x1x8x8xf32>
    %25 = vector.shape_cast %24 : vector<1x1x8x8xf32> to vector<8x8xf32>
    %26 = vector.shape_cast %17 : vector<8x8xf32> to vector<1x1x8x8xf32>
    tpu.vector_store %arg8[%c0_21, %c0_22, %c0_23, %c0_24], %26 {strides = array<i32>} : memref<1x1x8x8xf32, #tpu.memory_space<vmem>>, vector<1x1x8x8xf32>,
    return
  }
  func.func @transform_0(%arg0: i32, %arg1: i32, %arg2: i32) -> (i32, i32, i32) {
    %c0_i32 = arith.constant 0 : i32
    %c0_i32_0 = arith.constant 0 : i32
    return %arg0, %arg2, %c0_i32 : i32, i32, i32
  }
  func.func @transform_1(%arg0: i32, %arg1: i32, %arg2: i32) -> (i32, i32, i32) {
    %c0_i32 = arith.constant 0 : i32
    %c0_i32_0 = arith.constant 0 : i32
    %c0_i32_1 = arith.constant 0 : i32
    return %arg1, %c0_i32, %c0_i32_0 : i32, i32, i32
  }
  func.func @transform_2(%arg0: i32, %arg1: i32, %arg2: i32) -> (i32, i32, i32, i32) {
    %c0_i32 = arith.constant 0 : i32
    %c0_i32_0 = arith.constant 0 : i32
    %c0_i32_1 = arith.constant 0 : i32
    return %arg0, %arg1, %c0_i32, %c0_i32_0 : i32, i32, i32, i32
  }
  func.func @transform_3(%arg0: i32, %arg1: i32, %arg2: i32) -> (i32, i32, i32, i32) {
    %c0_i32 = arith.constant 0 : i32
    %c0_i32_0 = arith.constant 0 : i32
    %c0_i32_1 = arith.constant 0 : i32
    return %arg0, %arg1, %c0_i32, %c0_i32_0 : i32, i32, i32, i32
  }
  func.func @transform_4(%arg0: i32, %arg1: i32, %arg2: i32) -> (i32, i32, i32, i32) {
    %c0_i32 = arith.constant 0 : i32
    %c0_i32_0 = arith.constant 0 : i32
    return %arg0, %arg1, %arg2, %c0_i32 : i32, i32, i32, i32
  }
  func.func @transform_5(%arg0: i32, %arg1: i32, %arg2: i32) -> (i32, i32, i32, i32) {
    %c0_i32 = arith.constant 0 : i32
    %c0_i32_0 = arith.constant 0 : i32
    return %arg0, %arg1, %arg2, %c0_i32 : i32, i32, i32, i32
  }
}

</mosaic_0001>

<bundles_post_ra>
// kernel: tpu_custom_call.1
= control target key start
LH: loop header
LB: loop body
LE: loop exit
PB: predicated region body
PF: predicated region fallthrough
CT: control target
= control target key end

     0   :  { %s1293_s0 = inlined_call_operand.vmem [shape: f32[2,8,32], index: 0, kind: input, shape index: {}]   ;;  %s1294_s1 = inlined_call_operand.vmem [shape: f32[4,32,8], index: 1, kind: input, shape index: {}]   ;;  %s1295_s2 = inlined_call_operand.vmem [shape: f32[2,4,8,8], index: 2, kind: input, shape index: {}]   ;;  %s1296_s3 = inlined_call_operand.vmem [shape: f32[2,4,8,8], index: 3, kind: input, shape index: {}]   ;;  %s1297_s4 = inlined_call_operand.hbm [shape: f32[2,4,8,8], index: 4, kind: output, shape index: {0}]   ;;  %s1298_s5 = inlined_call_operand.hbm [shape: f32[2,4,8,8], index: 5, kind: output, shape index: {1}]  }
   0x1   :  { %1301 = sst [smem:[#allocation10_spill]] %s1294_s1 }
   0x2   :  { %11 = vsyncpa [#allocation3], 0 }
   0x3   :  { %13 = vsyncpa [#allocation3 + $0x1], 0 }
   0x4   :  { %14 = vsyncpa [#allocation5], 0 }
   0x5   :  { %16 = vsyncpa [#allocation5 + $0x1], 0  ;;  %s1100_s18 = smov 0   ;;  %s1102_s19 = smov 0  }
   0x6   :  { %s1104_s20 = smov 0   ;;  %s1106_s21 = smov 0  }
   0x7   :  { %s1108_s22 = smov 0   ;;  %s1110_s23 = smov 0  }
   0x8   :  { %s1112_s24 = smov 0   ;;  %s1114_s25 = smov 0  }
   0x9 LB: > { %s792_s26 = sadd.s32 4294967295, %s1063_s25   ;;  %s793_s27 = sadd.s32 4294967294, %s1063_s25   ;;  %s1063_s25 = sphi %s1114_s25, %s22_s25   ;;  %s1059_s24 = sphi %s1112_s24, %s1315_s24   ;;  %s1055_s23 = sphi %s1110_s23, %s1314_s23   ;;  %s1051_s22 = sphi %s1108_s22, %s1313_s22   ;;  %s1047_s21 = sphi %s1106_s21, %s1312_s21   ;;  %s1043_s20 = sphi %s1104_s20, %s1311_s20   ;;  %s1039_s19 = sphi %s1102_s19, %s1310_s19   ;;  %s1035_s18 = sphi %s1100_s18, %s1309_s18  }
   0xa   : > { %s37_s28 = sadd.s32 1, %s1055_s23  ;;  %s41_s29 = sadd.s32 1, %s1059_s24 }
   0xb   : > { %p39_p0 = scmp.ge.s32.totalorder %s37_s28, 4  ;;  %p172_p1 = scmp.ne.s32.totalorder %s1043_s20, %s1039_s19 }
   0xc   : > { %p173_p2 = scmp.eq.s32.totalorder %s792_s26, 7  ;;  %p178_p5 = scmp.ne.s32.totalorder %s1039_s19, %s1035_s18 }
   0xd   : > { %s1317_s28 = smov (%p39_p0, %s37_s28), 0  ;;  %s1319_s29 = smov (!%p39_p0, %s41_s29), %s1059_s24 }
   0xe   : > { %1302 = sst [smem:[#allocation8_spill]] %s1317_s28  ;;  %s156_s30 = ssub.s32 %s1055_s23, %s1317_s28 }
   0xf   : > { %p1151_p3 = por %p173_p2, %p172_p1  ;;  %p43_p4 = scmp.ge.s32.totalorder %s1319_s29, 2 }
  0x10   : > { %p179_p6 = scmp.eq.s32.totalorder %s793_s27, 7  ;;  %p796_p7 = scmp.ge.s32.totalorder %s1063_s25, 1 }
  0x11   : > { %s1321_s29 = smov (%p43_p4, %s1319_s29), 0  ;;  %p267_p9 = scmp.lt.s32.totalorder %s1063_s25, 9 }
  0x12   : > { %1304 = sst [smem:[#allocation9_spill]] %s1321_s29  ;;  %p1160_p8 = por %p179_p6, %p178_p5 }
  0x13   : > { %s155_s8 = ssub.s32 %s1059_s24, %s1321_s29  ;;  %s162_s9 = sadd.s32 1, %s1043_s20 }
  0x14   : > { %s157_s10 = sor.u32 %s156_s30, %s155_s8  ;;  %p268_p10 = pnand %p796_p7, %p267_p9 }
  0x15   : > { %p160_p11 = scmp.eq.s32.totalorder %s157_s10, 0  ;;  %p330_p12 = scmp.lt.s32.totalorder (!%p268_p10), %s1047_s21, 3  ;;  %v1065_v0 = vmov (!%p268_p10), 0.0|0.0   ;;  %vm1066_vm0 = vmmov (!%p268_p10), 0   ;;  %v1067_v1 = vmov (!%p268_p10), 0.0   ;;  %vm356_vm1 = vcmask (!%p268_p10), 261120  }
  0x16   : > { %271 = sbr.rel (%p268_p10) target bundleno = 1007 (0x3ef), region = 36  ;;  %p323_p13 = scmp.lt.s32.totalorder (!%p268_p10), %s1051_s22, 1  ;;  %848 = vmatprep.subr.bf16.mxu0 (!%p268_p10), %v1065_v0  ;;  %835 = vmatprep.mubr.msk.f32.mxu0 (!%p268_p10), %vm1066_vm0, %v1067_v1  ;;  %vm431_vm2 = vcmask (!%p268_p10), 64512  }
  0x17   : > { %s1169_s11 = scalar_select %p160_p11, %s1043_s20, %s162_s9  }
  0x18   : > { %838 = vmatprep.subr.mxu1 (!%p268_p10), %v1067_v1  ;;  %840 = vmatprep.mubr.msk.f32.mxu1 (!%p268_p10), %vm1066_vm0, %v1067_v1  ;;  %s1306_s1 = sld [smem:[#allocation10_spill]] (!%p268_p10) }
  0x1d   : > { %s331_s12 = scalar_select %p330_p12, %s1047_s21, 3 }
  0x1e   : > { %s324_s13 = scalar_select %p323_p13, %s1051_s22, 1 }
  0x1f   : > { %s817_s14 = sshll.u32 %s331_s12, 5 }
  0x20   : > { %s334_s17 = scalar_lea.vmem %s1306_s1, %s817_s14  ;;  %s799_s26 = sshll.u32 %s324_s13, 3 }
  0x21   : > { %v352_v2 = vld [vmem:[%s334_s17] sm:$0xff]  ;;  %v353_v3 = vld [vmem:[%s334_s17 + $0x8] sm:$0xff]  ;;  %v354_v4 = vld [vmem:[%s334_s17 + $0x10] sm:$0xff]  ;;  %s329_s8 = scalar_lea.vmem %s1293_s0, %s799_s26  ;;  %s802_s9 = sshll.u32 %s324_s13, 2 }
  0x22   : > { %v849_v5 = vpack.c.bf16 %v353_v3, %v352_v2  ;;  %v355_v6 = vld [vmem:[%s334_s17 + $0x18] sm:$0xff]  ;;  %v351_v8 = vld [vmem:[%s329_s8] sm:$0xff]  ;;  %s340_s10 = sadd.s32 %s802_s9, %s331_s12  ;;  %s811_s12 = sshll.u32 %s1051_s22, 2 }
  0x23   : > { %v852_v7 = vpack.c.bf16 %v355_v6, %v354_v4  ;;  %s803_s14 = sshll.u32 %s340_s10, 3  ;;  %s1203_s13 = sadd.s32 %s1047_s21, %s811_s12 }
  0x24   : > { %850 = vmatpush3.bf16.msra.mxu0 %v849_v5  ;;  %s342_s1 = scalar_lea.vmem %s1295_s2, %s803_s14  ;;  %s350_s28 = scalar_lea.vmem %s1296_s3, %s803_s14 }
  0x25   : > { %851 = vmatprep.subr.bf16.mxu0 %v1065_v0  ;;  %v430_v9 = vld [vmem:[%s342_s1] sm:$0xff]  ;;  %s1194_s1 = sand.u32 1, %s1039_s19   ;;  %s812_s26 = sshll.u32 %s1203_s13, 7 }
  0x26   : > { %839 = vmatpush3.msra.mxu1 %v430_v9  ;;  %v516_v10 = vld [vmem:[%s350_s28] sm:$0xff]  ;;  %s797_s28 = sshll.u32 %s1194_s1, 3  ;;  %s1211_s8 = scalar_lea.hbm %s1298_s5, %s812_s26 }
  0x27   : > { %843 = vmatprep.subr.mxu1 %v1067_v1  ;;  %s322_s29 = scalar_lea.vmem [#allocation4], %s797_s28  ;;  %s598_s10 = scalar_lea.sflag [#allocation5], %s1194_s1 }
  0x28   : > { %853 = vmatpush3.bf16.msra.mxu0 %v852_v7  ;;  %s630_s9 = sshll.u32 %s322_s29, 4  ;;  %s1068_s22 = smov [#allocation4]   ;;  %s631_s9 = int_to_ptr.vmem [resolvable:$true] %s630_s9 }
  0x29   : > { %s937_s14 = scalar_lea.vmem %s631_s9, 128  ;;  %s941_s21 = sshll.u32 %s1068_s22, 4  ;;  %s942_s21 = int_to_ptr.vmem [resolvable:$false] %s941_s21 }
  0x2a   : > { %p938_p0 = scmp.ne.s32.totalorder %s631_s9, %s937_s14  ;;  %s943_s15 = scalar_lea.vmem %s942_s21, 256 }
  0x2b   : > { %836 = vmatmul.mubr.msk.f32.vlgmr.msra.gmra.mrb[0].mxu0 %vm356_vm1, %v351_v8  ;;  %p944_p4 = scmp.lt.s32.totalorder %s631_s9, %s942_s21  ;;  %p945_p5 = scmp.lt.s32.totalorder %s943_s15, %s937_s14 }
  0x2c   : > { %p939_p1 = pnand %p938_p0, %p1151_p3 }
  0x2d   : > { %p946_p6 = por %p945_p5, %p944_p4 }
  0x2e   : > { %p940_p2 = pneg %p939_p1 }
  0x30   : > { %p947_p7 = pnand %p946_p6, %p940_p2 }
  0xfe   : > { %v426_v11 = vpop.f32.mrb[0].mxu0 }
  0xff   : > { %v837_v12 = vpop.f32.mrb[1].mxu0  ;;  %841 = vmatmul.mubr.msk.f32.vlgmr.msra.gmra.mrb[0].mxu1 %vm431_vm2, %v426_v11 }
 0x100   : > { %844 = vmatpush3.msra.mxu1 %v516_v10  ;;  %845 = vmatprep.mubr.msk.f32.mxu1 %vm1066_vm0, %v1067_v1 }
 0x1d2   : > { %v501_v13 = vpop.f32.mrb[0].mxu1 }
 0x1d3   : > { %v842_v14 = vpop.f32.mrb[1].mxu1  ;;  %v505_v15 = vsel %vm431_vm2, %v501_v13, -inf }
 0x1d4   : > { %506 = vmax.xlane.f32.xlu0 %v505_v15 }
 0x261   : > { %v507_v16 = vpop.xlane.xlu0 %506 }
 0x262   : > { %v508_v17 = vsub.f32 %v501_v13, %v507_v16 }
 0x264   : > { %v509_v18 = vmul.f32 1.442695, %v508_v17 }
 0x266   : > { %933 = vpow2.f32 %v509_v18 }
 0x270   : > { %v934_v19 = vpop.eup %933 }
 0x271   : > { %v511_v20 = vsel %vm431_vm2, %v934_v19, 0.0 }
 0x272   : > { %512 = vadd.xlane.f32.xlu0 %v511_v20 }
 0x2ff   : > { %v513_v21 = vpop.xlane.xlu0 %512 }
 0x300   : > { %935 = vrcp.f32 %v513_v21 }
 0x30a   : > { %v936_v22 = vpop.eup %935 }
 0x30b   : > { %v515_v23 = vmul.f32 %v936_v22, %v934_v19 }
 0x30d   : > { %846 = vmatmul.mubr.msk.f32.vlgmr.msra.gmra.mrb[2].mxu1 %vm431_vm2, %v515_v23  ;;  %591 = vst.msk [vmem:[%s322_s29] sm:$0xff] %vm431_vm2, %v515_v23 }
 0x30e   : > { %950 = shalt.err (!%p947_p7)
}
 0x30f   : > { %s951_s16 = scalar_lea.hbm %s1211_s8, 128  ;;  %s955_s12 = scalar_lea.hbm %s1298_s5, 1024 }
 0x310   : > { %p952_p9 = scmp.ne.s32.totalorder %s1211_s8, %s951_s16  ;;  %p956_p12 = scmp.lt.u32.totalorder %s1211_s8, %s1298_s5 }
 0x311   : > { %p957_p13 = scmp.lt.u32.totalorder %s955_s12, %s951_s16  ;;  %p959_p1 = scmp.lt.u32.totalorder %s951_s16, %s1211_s8 }
 0x312   : > { %p953_p10 = pnand %p952_p9, %p1151_p3 }
 0x313   : > { %p958_p0 = por %p957_p13, %p956_p12 }
 0x314   : > { %p954_p11 = pneg %p953_p10 }
 0x315   : > { %p960_p2 = por %p959_p1, %p958_p0 }
 0x317   : > { %p961_p4 = pnand %p960_p2, %p954_p11 }
 0x319   : > { %964 = shalt.err (!%p961_p4)
}
 0x31a   : > { %855 = dma.vmem_to_hbm [thread:$0]  (%p1151_p3), %s631_s9, 128, %s1211_s8, %s598_s10  }
 0x31b   : > { %s315_s14 = scalar_lea.vmem [#allocation2], %s797_s28  ;;  %s1238_s17 = scalar_lea.hbm %s1297_s4, %s812_s26 }
 0x31c   : > { %s614_s22 = sshll.u32 %s315_s14, 4  ;;  %s593_s16 = scalar_lea.sflag [#allocation3], %s1194_s1  ;;  %s1240_s22 = int_to_ptr.vmem [resolvable:$true] %s614_s22 }
 0x31d   : > { %s965_s8 = scalar_lea.vmem %s1240_s22, 128  ;;  %s1069_s28 = smov [#allocation2]  }
 0x31e   : > { %p966_p5 = scmp.ne.s32.totalorder %s1240_s22, %s965_s8  ;;  %s969_s13 = sshll.u32 %s1069_s28, 4  ;;  %s970_s13 = int_to_ptr.vmem [resolvable:$false] %s969_s13 }
 0x31f   : > { %s971_s26 = scalar_lea.vmem %s970_s13, 256  ;;  %p972_p9 = scmp.lt.s32.totalorder %s1240_s22, %s970_s13 }
 0x320   : > { %p967_p6 = pnand %p966_p5, %p1151_p3  ;;  %p973_p10 = scmp.lt.s32.totalorder %s971_s26, %s965_s8 }
 0x322   : > { %p968_p7 = pneg %p967_p6  ;;  %p974_p11 = por %p973_p10, %p972_p9 }
 0x324   : > { %p975_p12 = pnand %p974_p11, %p968_p7 }
 0x3e0   : > { %v586_v24 = vpop.f32.mrb[2].mxu1 }
 0x3e1   : > { %590 = vst.msk [vmem:[%s315_s14] sm:$0xff] %vm431_vm2, %v586_v24  ;;  %v847_v25 = vpop.f32.mrb[3].mxu1 }
 0x3e2   : > { %978 = shalt.err (!%p975_p12)
}
 0x3e3   : > { %s979_s1 = scalar_lea.hbm %s1238_s17, 128  ;;  %s983_s29 = scalar_lea.hbm %s1297_s4, 1024 }
 0x3e4   : > { %p980_p13 = scmp.ne.s32.totalorder %s1238_s17, %s979_s1  ;;  %p984_p2 = scmp.lt.u32.totalorder %s1238_s17, %s1297_s4 }
 0x3e5   : > { %p985_p4 = scmp.lt.u32.totalorder %s983_s29, %s979_s1  ;;  %p987_p6 = scmp.lt.u32.totalorder %s979_s1, %s1238_s17 }
 0x3e6   : > { %p981_p0 = pnand %p980_p13, %p1151_p3 }
 0x3e7   : > { %p986_p5 = por %p985_p4, %p984_p2 }
 0x3e8   : > { %p982_p1 = pneg %p981_p0 }
 0x3e9   : > { %p988_p7 = por %p987_p6, %p986_p5 }
 0x3eb   : > { %p989_p9 = pnand %p988_p7, %p982_p1 }
 0x3ed   : > { %992 = shalt.err (!%p989_p9)
}
 0x3ee   : > { %854 = dma.vmem_to_hbm [thread:$0]  (%p1151_p3), %s1240_s22, 128, %s1238_s17, %s593_s16  }
 0x3ef PF: > { %p865_p10 = scmp.ge.s32.totalorder %s1063_s25, 2  ;;  %s642_s30 = sand.u32 1, %s1035_s18  }
 0x3f0   : > { %s643_s14 = scalar_lea.sflag [#allocation3], %s642_s30 }
 0x3f1   : > { %p859_p11 = pnand %p865_p10, %p1160_p8 }
 0x3f3   : > { %1026 = dma.done.wait (!%p859_p11), %s643_s14, 128  }
 0x3f4   : > { %1028 = vsyncadd (!%p859_p11), %s643_s14, 4294967168  ;;  %s652_s21 = scalar_lea.sflag [#allocation5], %s642_s30 }
 0x3f5   : > { %1030 = dma.done.wait (!%p859_p11), %s652_s21, 128  }
 0x3f6   : > { %1032 = vsyncadd (!%p859_p11), %s652_s21, 4294967168  ;;  %s22_s25 = sadd.s32 1, %s1063_s25   ;;  %s1307_s6 = sld [smem:[#allocation8_spill]] }
 0x3f7   : > { %p19_p12 = scmp.ge.s32.totalorder %s22_s25, 10   ;;  %s1308_s15 = sld [smem:[#allocation9_spill]] }
 0x3f8   : > { %s1309_s18 = smov %s1039_s19  ;;  %s1310_s19 = smov %s1043_s20 }
 0x3f9   : > { %s1311_s20 = smov %s1169_s11  ;;  %s1312_s21 = smov %s1055_s23 }
 0x3fa   : > { %s1313_s22 = smov %s1059_s24  ;;  %21 = sbr.rel (!%p19_p12) target bundleno = 9 (0x9), region = 97 }
 0x3fc   : > { %s1314_s23 = smov %s1307_s6 }
 0x3fd   : > { %s1315_s24 = smov %s1308_s15 }
 0x401   :  { %657 = vsyncpa [#allocation3], 1 }
 0x402   :  { %659 = vsyncpa [#allocation3 + $0x1], 1 }
 0x403   :  { %660 = vsyncpa [#allocation5], 1 }
 0x404   :  { %662 = vsyncpa [#allocation5 + $0x1], 1 }

</bundles_post_ra>
